<compile_context>
chip_gen: v7x
topology: tpu7x:2x2x1
jax: 0.10.0
libtpu: 0.0.40
codegen_flags: <defaults>
</compile_context>

<pallas_src>
import functools
from typing import Optional

import jax
import jax.numpy as jnp
from jax.experimental import pallas as pl
from jax.experimental.pallas import tpu as pltpu


def _round_up(x: int, m: int) -> int:
    return ((x + m - 1) // m) * m


def _vmem_capacity_bytes() -> int:
    """Generation-aware VMEM capacity; falls back to the smallest per-TC size
    across supported chips (v7x: 64 MiB) so the derived budget is always legal."""
    try:
        info = pltpu.get_tpu_info()
        cap = int(getattr(info, "vmem_capacity_bytes", 0))
        if cap > 0:
            return cap
    except Exception:
        pass
    return 64 << 20


def _mish(x, *, approx: bool):
    # mish(x) = x * tanh(softplus(x)) = x * t*(t+2) / (t*(t+2) + 2),  t = exp(x)
    # Single EUP exp. Clamp the exponent so exp never overflows; for x >= 20
    # the factor is 1 to f32 precision, so mish(x) == x there.
    t = jnp.exp(jnp.minimum(x, 20.0))
    n = t * (t + 2.0)
    d = n + 2.0
    if approx:
        return x * n * pl.reciprocal(d, approx=True)
    return x * (n / d)


# --------------------------------------------------------------------------- #
# Kernels
# --------------------------------------------------------------------------- #
def _mlp_kernel(x_ref, w1_ref, b1_ref, w2_ref, b2_ref, o_ref, acc_ref, *,
                act_out: bool):
    """Tiled path: grid = (batch tiles, hidden K-tiles), f32 VMEM accumulator."""
    k = pl.program_id(1)

    @pl.when(k == 0)
    def _():
        # Seed the accumulator with the output bias -> no add in the epilogue.
        acc_ref[...] = jnp.broadcast_to(
            b2_ref[...].astype(jnp.float32), acc_ref.shape)

    cd = w1_ref.dtype   # MXU compute dtype (bf16 if weights were prepared so)
    h = jnp.dot(x_ref[...].astype(cd), w1_ref[...],
                preferred_element_type=jnp.float32)
    h = _mish(h + b1_ref[...], approx=True)     # b1 is (1, tile_h), broadcasts
    acc_ref[...] += jnp.dot(h.astype(w2_ref.dtype), w2_ref[...],
                            preferred_element_type=jnp.float32)

    @pl.when(k == pl.num_programs(1) - 1)
    def _():
        y = acc_ref[...]
        if act_out:
            y = _mish(y, approx=False)          # exact divide on the output act
        o_ref[...] = y.astype(o_ref.dtype)


def _mlp_small_kernel(x_ref, w1_ref, b1_ref, w2_ref, b2_ref, o_ref, *,
                      act_out: bool):
    """Single-block fast path: whole (unpadded) arrays resident in VMEM."""
    cd = w1_ref.dtype
    h = jnp.dot(x_ref[...].astype(cd), w1_ref[...],
                preferred_element_type=jnp.float32)
    h = _mish(h + b1_ref[...], approx=True)
    y = jnp.dot(h.astype(w2_ref.dtype), w2_ref[...],
                preferred_element_type=jnp.float32) + b2_ref[...]
    if act_out:
        y = _mish(y, approx=False)
    o_ref[...] = y.astype(o_ref.dtype)


# --------------------------------------------------------------------------- #
# Wrappers
# --------------------------------------------------------------------------- #
def _small_problem(B, in_dim, hidden, out_dim, itemsize) -> bool:
    elems = (B * in_dim + in_dim * hidden + hidden + hidden * out_dim + out_dim
             + B * out_dim + 2 * B * hidden)
    return elems * max(itemsize, 4) <= (2 << 20)     # <= ~2 MiB working set


def _mlp_small(x, w1, b1, w2, b2, *, act_out, compute_dtype=None):
    B, _ = x.shape
    hidden = w1.shape[1]
    out_dim = w2.shape[1]
    if compute_dtype is not None:
        w1 = w1.astype(compute_dtype)
        w2 = w2.astype(compute_dtype)
    kernel = functools.partial(_mlp_small_kernel, act_out=act_out)
    return pl.pallas_call(
        kernel,
        out_shape=jax.ShapeDtypeStruct((B, out_dim), x.dtype),
    )(x, w1,
      b1.astype(jnp.float32).reshape(1, hidden),
      w2,
      b2.astype(jnp.float32).reshape(1, out_dim))


def prepare_mlp_params(w1, b1, w2, b2, *, compute_dtype=None,
                       tile_h: Optional[int] = None, max_tile_b: int = 256,
                       vmem_budget: Optional[int] = None):
    """One-time weight preparation (padding + optional bf16 cast).

    Hoists the per-call jnp.pad HBM traffic out of the forward path; reuse the
    returned params dict across calls.
    """
    in_dim, hidden = w1.shape
    hidden2, out_dim = w2.shape
    assert hidden2 == hidden and b1.shape == (hidden,) and b2.shape == (out_dim,)

    wdtype = jnp.dtype(compute_dtype) if compute_dtype is not None else w1.dtype
    w_bytes = jnp.dtype(wdtype).itemsize
    x_bytes = 4                                   # budget pessimistically (f32)

    in_p = _round_up(in_dim, 128)
    out_p = _round_up(out_dim, 128)
    hid_128 = _round_up(hidden, 128)

    if vmem_budget is None:
        vmem_budget = max(_vmem_capacity_bytes() - (24 << 20), 24 << 20)

    def _fits(tb, th):
        io = 2 * (tb * in_p * x_bytes                   # x tile (dbl-buffered)
                  + th * (in_p + out_p) * w_bytes       # W1 N-tile + W2 K-tile
                  + (th + out_p) * 4                    # bias tiles
                  + tb * out_p * x_bytes)               # output tile
        scratch = tb * out_p * 4 + 2 * tb * th * 4      # f32 acc + h temporary
        return io + scratch <= vmem_budget

    if tile_h is None:
        th = hid_128
        while th > 128 and not _fits(max_tile_b, th):
            th = max(128, _round_up(th // 2, 128))
        tile_h = th
    tile_h = min(max(128, _round_up(tile_h, 128)), hid_128)
    hidden_p = _round_up(hid_128, tile_h)

    w1_p = jnp.pad(w1, ((0, in_p - in_dim), (0, hidden_p - hidden))).astype(wdtype)
    w2_p = jnp.pad(w2, ((0, hidden_p - hidden), (0, out_p - out_dim))).astype(wdtype)
    b1_p = jnp.pad(b1.astype(jnp.float32),
                   ((0, hidden_p - hidden),)).reshape(1, hidden_p)
    b2_p = jnp.pad(b2.astype(jnp.float32),
                   ((0, out_p - out_dim),)).reshape(1, out_p)

    return dict(w1=w1_p, b1=b1_p, w2=w2_p, b2=b2_p,
                in_dim=in_dim, hidden=hidden, out_dim=out_dim,
                in_p=in_p, out_p=out_p, hidden_p=hidden_p,
                tile_h=tile_h, vmem_budget=vmem_budget)


def mlp_pallas_prepared(x, params, *, act_out: bool = False,
                        tile_b: Optional[int] = None):
    """Apply the fused MLP using pre-padded / pre-cast params."""
    B, in_dim = x.shape
    assert in_dim == params["in_dim"]
    in_p, out_p, hidden_p = params["in_p"], params["out_p"], params["hidden_p"]
    out_dim, tile_h = params["out_dim"], params["tile_h"]
    vmem_budget = params["vmem_budget"]
    w1_p, b1_p, w2_p, b2_p = params["w1"], params["b1"], params["w2"], params["b2"]
    w_bytes = w1_p.dtype.itemsize
    x_bytes = x.dtype.itemsize

    # --- batch tile: fill the 256x256 MXU when B allows, but keep >= 2 batch
    # tiles on the "parallel" axis for megacore when B >= 256. ---------------
    if tile_b is None:
        if B >= 512:
            tile_b = 256
        elif B >= 128:
            tile_b = 128
        else:
            tile_b = _round_up(B, 8)
    tile_b = max(8, _round_up(min(tile_b, _round_up(B, 8)), 8))

    def _fits(tb):
        io = 2 * (tb * in_p * x_bytes + tile_h * (in_p + out_p) * w_bytes
                  + (tile_h + out_p) * 4 + tb * out_p * x_bytes)
        scratch = tb * out_p * 4 + 2 * tb * tile_h * 4
        return io + scratch <= vmem_budget

    while tile_b > 8 and not _fits(tile_b):
        tile_b = max(8, _round_up(tile_b // 2, 8))

    B_p = _round_up(B, tile_b)
    num_b, num_k = B_p // tile_b, hidden_p // tile_h
    grid = (num_b, num_k)

    # --- pad x only if required (weights were padded once in prepare) -------
    if B_p != B or in_p != in_dim:
        x_p = jnp.pad(x, ((0, B_p - B), (0, in_p - in_dim)))
    else:
        x_p = x

    # --- generation-aware VMEM limit ----------------------------------------
    need = (2 * (tile_b * in_p * x_bytes + tile_h * (in_p + out_p) * w_bytes
                 + (tile_h + out_p) * 4 + tile_b * out_p * x_bytes)
            + tile_b * out_p * 4 + 2 * tile_b * tile_h * 4)
    cap = _vmem_capacity_bytes() - (16 << 20)
    vmem_limit = int(min(max(need + (8 << 20), 16 << 20), cap))

    # --- advisory cost (weights re-streamed per batch tile only if num_k > 1) -
    weight_passes = num_b if num_k > 1 else 1
    cost = pl.CostEstimate(
        flops=2 * B_p * hidden_p * (in_p + out_p),
        transcendentals=2 * B_p * hidden_p + (2 * B_p * out_p if act_out else 0),
        bytes_accessed=(x_bytes * B_p * in_p + x_bytes * B_p * out_p
                        + weight_passes * w_bytes * hidden_p * (in_p + out_p)
                        + 4 * (hidden_p + out_p)),
    )

    kernel = functools.partial(_mlp_kernel, act_out=act_out)

    out = pl.pallas_call(
        kernel,
        out_shape=jax.ShapeDtypeStruct((B_p, out_p), x.dtype),
        grid_spec=pltpu.PrefetchScalarGridSpec(
            num_scalar_prefetch=0,
            grid=grid,
            in_specs=[
                pl.BlockSpec((tile_b, in_p), lambda i, k: (i, 0)),    # x rows
                pl.BlockSpec((in_p, tile_h), lambda i, k: (0, k)),    # W1 N-tile
                pl.BlockSpec((1, tile_h), lambda i, k: (0, k)),       # b1 tile
                pl.BlockSpec((tile_h, out_p), lambda i, k: (k, 0)),   # W2 K-tile
                pl.BlockSpec((1, out_p), lambda i, k: (0, 0)),        # b2
            ],
            out_specs=pl.BlockSpec((tile_b, out_p), lambda i, k: (i, 0)),
            scratch_shapes=[pltpu.VMEM((tile_b, out_p), jnp.float32)],
        ),
        compiler_params=pltpu.CompilerParams(
            dimension_semantics=("parallel", "arbitrary"),
            vmem_limit_bytes=vmem_limit,
        ),
        cost_estimate=cost,
    )(x_p, w1_p, b1_p, w2_p, b2_p)

    if B_p != B or out_p != out_dim:
        out = out[:B, :out_dim]
    return out


def mlp_pallas(x, w1, b1, w2, b2, *, act_out: bool = False, compute_dtype=None,
               tile_b: Optional[int] = None, tile_h: Optional[int] = None,
               small_path: Optional[bool] = None):
    """Convenience wrapper. For repeated calls with the same weights, prefer
    prepare_mlp_params() + mlp_pallas_prepared() so weight padding/casting
    happens once instead of per forward pass."""
    B, in_dim = x.shape
    hidden = w1.shape[1]
    out_dim = w2.shape[1]
    if small_path is None:
        small_path = _small_problem(B, in_dim, hidden, out_dim, x.dtype.itemsize)
    if small_path:
        return _mlp_small(x, w1, b1, w2, b2, act_out=act_out,
                          compute_dtype=compute_dtype)
    params = prepare_mlp_params(w1, b1, w2, b2, compute_dtype=compute_dtype,
                                tile_h=tile_h)
    return mlp_pallas_prepared(x, params, act_out=act_out, tile_b=tile_b)


# --------------------------------------------------------------------------- #
# Reference + tests
# --------------------------------------------------------------------------- #
def _ref_mlp(x, w1, b1, w2, b2, act_out=False):
    def mish(v):
        return v * jnp.tanh(jax.nn.softplus(v))
    h = mish(x @ w1 + b1)
    y = h @ w2 + b2
    return mish(y) if act_out else y


def _make_params(key, B, IN, HID, OUT):
    kx, k1, k2, k3, k4 = jax.random.split(key, 5)
    x = jax.random.normal(kx, (B, IN), dtype=jnp.float32)
    w1 = jax.random.normal(k1, (IN, HID), dtype=jnp.float32) * (1.0 / IN ** 0.5)
    b1 = jax.random.normal(k2, (HID,), dtype=jnp.float32) * 0.01
    w2 = jax.random.normal(k3, (HID, OUT), dtype=jnp.float32) * (1.0 / HID ** 0.5)
    b2 = jax.random.normal(k4, (OUT,), dtype=jnp.float32) * 0.01
    return x, w1, b1, w2, b2


if __name__ == "__main__":
    key = jax.random.PRNGKey(0)
    k_a, k_b, k_c = jax.random.split(key, 3)

    # Case 1: module-default-ish shapes, small single-block fast path (no pads).
    B, IN, HID, OUT = 16, 32, 64, 32
    x, w1, b1, w2, b2 = _make_params(k_a, B, IN, HID, OUT)
    y = mlp_pallas(x, w1, b1, w2, b2, act_out=False)
    jax.block_until_ready(y)
    y_ref = _ref_mlp(x, w1, b1, w2, b2, act_out=False)
    assert y.shape == (B, OUT)
    assert jnp.allclose(y, y_ref, atol=5e-3, rtol=5e-3), "mismatch (case 1)"

    # Case 2: ragged shapes, forced tiled path -> padding, multi-tile grid
    # (3 batch tiles x 2 hidden K-tiles), b2-seeded accumulator, act_out mish.
    B2, IN2, HID2, OUT2 = 20, 24, 160, 40
    x2, w1_2, b1_2, w2_2, b2_2 = _make_params(k_b, B2, IN2, HID2, OUT2)
    y2 = mlp_pallas(x2, w1_2, b1_2, w2_2, b2_2, act_out=True,
                    tile_b=8, tile_h=128, small_path=False)
    jax.block_until_ready(y2)
    y2_ref = _ref_mlp(x2, w1_2, b1_2, w2_2, b2_2, act_out=True)
    assert y2.shape == (B2, OUT2)
    assert jnp.allclose(y2, y2_ref, atol=5e-3, rtol=5e-3), "mismatch (case 2)"

    # Case 3: prepared-params flow (weight padding hoisted out of the call)
    # with the bf16 MXU path and f32 accumulation.
    B3, IN3, HID3, OUT3 = 32, 64, 128, 64
    x3, w1_3, b1_3, w2_3, b2_3 = _make_params(k_c, B3, IN3, HID3, OUT3)
    params3 = prepare_mlp_params(w1_3, b1_3, w2_3, b2_3,
                                 compute_dtype=jnp.bfloat16)
    y3 = mlp_pallas_prepared(x3, params3, act_out=False)
    jax.block_until_ready(y3)
    y3_ref = _ref_mlp(x3, w1_3, b1_3, w2_3, b2_3, act_out=False)
    assert y3.shape == (B3, OUT3)
    assert jnp.allclose(y3, y3_ref, atol=6e-2, rtol=6e-2), "mismatch (case 3)"

    print("KERNEL_OK")
</pallas_src>

<mosaic_0001>
module attributes {stable_mosaic.version = 11 : i64} {
  func.func @_mlp_small_kernel(%arg0: memref<16x32xf32, #tpu.memory_space<vmem>>, %arg1: memref<32x64xf32, #tpu.memory_space<vmem>>, %arg2: memref<1x64xf32, #tpu.memory_space<vmem>>, %arg3: memref<64x32xf32, #tpu.memory_space<vmem>>, %arg4: memref<1x32xf32, #tpu.memory_space<vmem>>, %arg5: memref<16x32xf32, #tpu.memory_space<vmem>>) attributes {dimension_semantics = [], scalar_prefetch = 0 : i64, scratch_operands = 0 : i64, tpu.core_type = #tpu.core_type<tc>} {
    %c0 = arith.constant 0 : index
    %c0_0 = arith.constant 0 : index
    %0 = vector.load %arg0[%c0, %c0_0] : memref<16x32xf32, #tpu.memory_space<vmem>>, vector<16x32xf32>
    %c0_1 = arith.constant 0 : index
    %c0_2 = arith.constant 0 : index
    %1 = vector.load %arg1[%c0_1, %c0_2] : memref<32x64xf32, #tpu.memory_space<vmem>>, vector<32x64xf32>
    %cst = arith.constant dense<0.000000e+00> : vector<16x64xf32>
    %2 = tpu.matmul %0, %1, %cst {dimension_numbers = #tpu.dot_dimension_numbers<[1], [0], [0], [1], [0, 0, 1, 1], [], []>} : vector<16x32xf32>, vector<32x64xf32>, vector<16x64xf32> -> vector<16x64xf32>
    %c0_3 = arith.constant 0 : index
    %c0_4 = arith.constant 0 : index
    %3 = vector.load %arg2[%c0_3, %c0_4] : memref<1x64xf32, #tpu.memory_space<vmem>>, vector<1x64xf32>
    %4 = vector.broadcast %3 : vector<1x64xf32> to vector<16x64xf32>
    %5 = arith.addf %2, %4 : vector<16x64xf32>
    %cst_5 = arith.constant 2.000000e+01 : f32
    %6 = vector.broadcast %cst_5 : f32 to vector<16x64xf32>
    %7 = arith.minimumf %5, %6 : vector<16x64xf32>
    %8 = math.exp %7 : vector<16x64xf32>
    %cst_6 = arith.constant 2.000000e+00 : f32
    %9 = vector.broadcast %cst_6 : f32 to vector<16x64xf32>
    %10 = arith.addf %8, %9 : vector<16x64xf32>
    %11 = arith.mulf %8, %10 : vector<16x64xf32>
    %cst_7 = arith.constant 2.000000e+00 : f32
    %12 = vector.broadcast %cst_7 : f32 to vector<16x64xf32>
    %13 = arith.addf %11, %12 : vector<16x64xf32>
    %14 = arith.mulf %5, %11 : vector<16x64xf32>
    %15 = tpu.reciprocal %13 {approx = true} : vector<16x64xf32> -> vector<16x64xf32>
    %16 = arith.mulf %14, %15 : vector<16x64xf32>
    %c0_8 = arith.constant 0 : index
    %c0_9 = arith.constant 0 : index
    %17 = vector.load %arg3[%c0_8, %c0_9] : memref<64x32xf32, #tpu.memory_space<vmem>>, vector<64x32xf32>
    %cst_10 = arith.constant dense<0.000000e+00> : vector<16x32xf32>
    %18 = tpu.matmul %16, %17, %cst_10 {dimension_numbers = #tpu.dot_dimension_numbers<[1], [0], [0], [1], [0, 0, 1, 1], [], []>} : vector<16x64xf32>, vector<64x32xf32>, vector<16x32xf32> -> vector<16x32xf32>
    %c0_11 = arith.constant 0 : index
    %c0_12 = arith.constant 0 : index
    %19 = vector.load %arg4[%c0_11, %c0_12] : memref<1x32xf32, #tpu.memory_space<vmem>>, vector<1x32xf32>
    %20 = vector.broadcast %19 : vector<1x32xf32> to vector<16x32xf32>
    %21 = arith.addf %18, %20 : vector<16x32xf32>
    %c0_13 = arith.constant 0 : index
    %c0_14 = arith.constant 0 : index
    %22 = vector.load %arg5[%c0_13, %c0_14] : memref<16x32xf32, #tpu.memory_space<vmem>>, vector<16x32xf32>
    tpu.vector_store %arg5[%c0_13, %c0_14], %21 {strides = array<i32>} : memref<16x32xf32, #tpu.memory_space<vmem>>, vector<16x32xf32>,
    return
  }
}

</mosaic_0001>

<bundles_post_ra>
// kernel: tpu_custom_call.1
= control target key start
LH: loop header
LB: loop body
LE: loop exit
PB: predicated region body
PF: predicated region fallthrough
CT: control target
= control target key end

     0   :  { %vm34_vm0 = vcmask 261120   ;;  %s457_s0 = inlined_call_operand.vmem [shape: f32[16,32], index: 0, kind: input, shape index: {}]   ;;  %s458_s1 = inlined_call_operand.vmem [shape: f32[32,64], index: 1, kind: input, shape index: {}]   ;;  %s459_s2 = inlined_call_operand.vmem [shape: f32[1,64], index: 2, kind: input, shape index: {}]   ;;  %s460_s3 = inlined_call_operand.vmem [shape: f32[64,32], index: 3, kind: input, shape index: {}]   ;;  %s461_s4 = inlined_call_operand.vmem [shape: f32[1,32], index: 4, kind: input, shape index: {}]   ;;  %s462_s5 = inlined_call_operand.hbm [shape: f32[16,32], index: 5, kind: output, shape index: {}]  }
   0x1   :  { %v23_v0 = vld [vmem:[%s458_s1] sm:$0xff]  ;;  %v24_v1 = vld [vmem:[%s458_s1 + $0x8] sm:$0xff]  ;;  %v25_v2 = vld [vmem:[%s458_s1 + $0x10] sm:$0xff] }
   0x2   :  { %v301_v3 = vpack.c.bf16 %v24_v1, %v23_v0  ;;  %v26_v4 = vld [vmem:[%s458_s1 + $0x18] sm:$0xff]  ;;  %v21_v5 = vld [vmem:[%s457_s0] sm:$0xff] }
   0x3   :  { %v305_v6 = vpack.c.bf16 %v26_v4, %v25_v2  ;;  %279 = vmatprep.mubr.msk.f32.mxu0 %vm34_vm0, %v21_v5 }
   0x4   :  { %10 = vsyncpa [#allocation3], 0  ;;  %302 = vmatprep.subr.bf16.mxu0 %v301_v3  ;;  %v22_v7 = vld [vmem:[%s457_s0 + $0x8] sm:$0xff]  ;;  %v134_v8 = vld [vmem:[%s460_s3] sm:$0xff]  ;;  %vm149_vm1 = vcmask 523264   ;;  %s360_s21 = smov [#allocation2]  }
   0x5   :  { %304 = vmatpush3.bf16.msra.mxu0 %v301_v3  ;;  %v135_v9 = vld [vmem:[%s460_s3 + $0x8] sm:$0xff]  ;;  %v136_v11 = vld [vmem:[%s460_s3 + $0x10] sm:$0xff]  ;;  %v137_v12 = vld [vmem:[%s460_s3 + $0x18] sm:$0xff]  ;;  %s238_s22 = sshll.u32 %s360_s21, 4  ;;  %s239_s22 = int_to_ptr.vmem [resolvable:$true] %s238_s22 }
   0x6   :  { %306 = vmatprep.subr.bf16.mxu0 %v305_v6  ;;  %v309_v10 = vpack.c.bf16 %v135_v9, %v134_v8  ;;  %v313_v13 = vpack.c.bf16 %v137_v12, %v136_v11  ;;  %v138_v14 = vld [vmem:[%s460_s3 + $0x20] sm:$0xff]  ;;  %v139_v15 = vld [vmem:[%s460_s3 + $0x28] sm:$0xff]  ;;  %v140_v17 = vld [vmem:[%s460_s3 + $0x30] sm:$0xff]  ;;  %s336_s23 = scalar_lea.vmem %s239_s22, 256  ;;  %p341_p1 = scmp.lt.s32.totalorder %s239_s22, %s239_s22 }
   0x7   :  { %v317_v16 = vpack.c.bf16 %v139_v15, %v138_v14  ;;  %v141_v18 = vld [vmem:[%s460_s3 + $0x38] sm:$0xff]  ;;  %v249_v20 = vld [vmem:[%s459_s2] ss:$0 sm:$0xff]  ;;  %p337_p0 = scmp.ne.s32.totalorder %s239_s22, %s336_s23  ;;  %p342_p2 = scmp.lt.s32.totalorder %s336_s23, %s336_s23 }
   0x8   :  { %310 = vmatprep.subr.bf16.mxu1 %v309_v10  ;;  %v321_v19 = vpack.c.bf16 %v141_v18, %v140_v17  ;;  %v252_v43 = vld [vmem:[%s461_s4] ss:$0 sm:$0xff] }
   0x9   :  { %308 = vmatpush3.bf16.msra.mxu0 %v305_v6  ;;  %312 = vmatpush3.bf16.msra.mxu1 %v309_v10  ;;  %p343_p3 = por %p342_p2, %p341_p1 }
   0xa   :  { %314 = vmatprep.subr.bf16.mxu1 %v313_v13 }
   0xb   :  { %p344_p4 = pnand %p343_p3, %p337_p0 }
   0xc   :  { %280 = vmatmul.mubr.msk.f32.vlgmr.msra.gmra.mrb[0].mxu0 %vm34_vm0, %v22_v7 }
   0xd   :  { %316 = vmatpush3.bf16.msra.mxu1 %v313_v13 }
   0xe   :  { %318 = vmatprep.subr.bf16.mxu1 %v317_v16 }
  0x11   :  { %320 = vmatpush3.bf16.msra.mxu1 %v317_v16 }
  0x12   :  { %322 = vmatprep.subr.bf16.mxu1 %v321_v19 }
  0x15   :  { %324 = vmatpush3.bf16.msra.mxu1 %v321_v19 }
  0xdf   :  { %v281_v21 = vpop.f32.mrb[0].mxu0 }
  0xe0   :  { %v113_v22 = vadd.f32 %v281_v21, %v249_v20  ;;  %v107_v23 = vpop.f32.mrb[1].mxu0 }
  0xe1   :  { %v108_v24 = vadd.f32 %v249_v20, %v107_v23 }
  0xe2   :  { %v117_v25 = vmin.f32 %v113_v22, 20.0 }
  0xe3   :  { %v116_v26 = vmin.f32 %v108_v24, 20.0 }
  0xe4   :  { %v120_v27 = vmul.f32 1.442695, %v117_v25 }
  0xe5   :  { %v118_v28 = vmul.f32 1.442695, %v116_v26 }
  0xe6   :  { %328 = vpow2.f32 %v120_v27 }
  0xe7   :  { %330 = vpow2.f32 %v118_v28 }
  0xf0   :  { %v329_v29 = vpop.eup %328 }
  0xf1   :  { %v331_v30 = vpop.eup %330  ;;  %v123_v31 = vadd.f32 2.0, %v329_v29 }
  0xf2   :  { %v122_v32 = vadd.f32 2.0, %v331_v30 }
  0xf3   :  { %v125_v33 = vmul.f32 %v329_v29, %v123_v31 }
  0xf4   :  { %v124_v34 = vmul.f32 %v331_v30, %v122_v32 }
  0xf5   :  { %v127_v35 = vadd.f32 2.0, %v125_v33  ;;  %v129_v40 = vmul.f32 %v125_v33, %v113_v22 }
  0xf6   :  { %v126_v36 = vadd.f32 2.0, %v124_v34  ;;  %v128_v38 = vmul.f32 %v124_v34, %v108_v24 }
  0xf7   :  { %332 = vrcp.f32 %v127_v35 }
  0xf8   :  { %334 = vrcp.f32 %v126_v36 }
 0x101   :  { %v333_v37 = vpop.eup %332 }
 0x102   :  { %v335_v39 = vpop.eup %334  ;;  %v133_v42 = vmul.f32 %v333_v37, %v129_v40 }
 0x103   :  { %v132_v41 = vmul.f32 %v335_v39, %v128_v38 }
 0x105   :  { %298 = vmatprep.mubr.msk.f32.mxu1 %vm149_vm1, %v132_v41 }
 0x106   :  { %299 = vmatmul.mubr.msk.f32.vlgmr.msra.gmra.mrb[0].mxu1 %vm149_vm1, %v133_v42 }
 0x1d9   :  { %v300_v44 = vpop.f32.mrb[0].mxu1 }
 0x1da   :  { %v228_v45 = vadd.f32 %v300_v44, %v252_v43  ;;  %v222_v46 = vpop.f32.mrb[1].mxu1 }
 0x1db   :  { %v223_v47 = vadd.f32 %v252_v43, %v222_v46 }
 0x1dc   :  { %232 = vst.msk [vmem:[#allocation2 + $0x8] sm:$0xff] %vm34_vm0, %v228_v45 }
 0x1dd   :  { %231 = vst.msk [vmem:[#allocation2] sm:$0xff] %vm34_vm0, %v223_v47 }
 0x1de   :  { %347 = shalt.err (!%p344_p4)
}
 0x1df   :  { %s348_s25 = scalar_lea.hbm %s462_s5, 256 }
 0x1e0   :  { %p349_p5 = scmp.ne.s32.totalorder %s462_s5, %s348_s25  ;;  %p352_p6 = scmp.lt.u32.totalorder %s348_s25, %s462_s5 }
 0x1e2   :  { %p354_p7 = pnand %p352_p6, %p349_p5 }
 0x1e4   :  { %357 = shalt.err (!%p354_p7)
}
 0x1e5   :  { %s361_s30 = smov 128   ;;  %s362_s1 = smov 8  }
 0x1e6   :  { %244 = dma.vmem_to_hbm [thread:$0]  %s239_s22, 256, %s462_s5, [#allocation3], %s361_s30, %s361_s30, %s362_s1  }
 0x1e7   :  { %358 = dma.done.wait [#allocation3], 256  }
 0x1e8   :  { %359 = vsyncadd [#allocation3], 4294967040 }
 0x1e9   :  { %248 = vsyncpa [#allocation3], 1 }

</bundles_post_ra>
